<compile_context>
chip_gen: v6e
topology: v6e:2x2x1
jax: 0.10.0
libtpu: 0.0.40
codegen_flags: <defaults>
</compile_context>

<pallas_src>
import jax
import jax.numpy as jnp
from jax.experimental import pallas as pl
from jax.experimental.pallas import tpu as pltpu


# ---------------------------------------------------------------------------
# helpers
# ---------------------------------------------------------------------------
def _row_block(m: int) -> int:
    """Largest row tile (multiple of 8) that divides m; else full extent."""
    for tb in (1024, 512, 256, 128, 64, 32, 16, 8):
        if m % tb == 0:
            return tb
    return m


def _quick_gelu(x):
    # x * sigmoid(1.702 * x), hand-rolled with exp so kernel and reference
    # use the exact same formula.
    return x * (1.0 / (1.0 + jnp.exp(-1.702 * x)))


# ---------------------------------------------------------------------------
# fused linear kernel:  out = [residual +] act(x @ W + b)
# ---------------------------------------------------------------------------
def _make_linear_kernel(activation: str, has_residual: bool):
    def kernel(*refs):
        if has_residual:
            x_ref, w_ref, b_ref, r_ref, o_ref = refs
        else:
            x_ref, w_ref, b_ref, o_ref = refs
        acc = jnp.dot(x_ref[...], w_ref[...], preferred_element_type=jnp.float32)
        acc = acc + b_ref[...].astype(jnp.float32)
        if activation == "quick_gelu":
            acc = _quick_gelu(acc)
        if has_residual:
            acc = acc + r_ref[...].astype(jnp.float32)
        o_ref[...] = acc.astype(o_ref.dtype)

    return kernel


def pallas_linear(x, w, b, *, residual=None, activation="none"):
    """x: (M, K), w: (K, N) [already transposed -> lane-dense output], b: (N,)."""
    M, K = x.shape
    K2, N = w.shape
    assert K == K2
    tm = _row_block(M)
    in_specs = [
        pl.BlockSpec((tm, K), lambda i: (i, 0)),
        pl.BlockSpec((K, N), lambda i: (0, 0)),
        pl.BlockSpec((1, N), lambda i: (0, 0)),
    ]
    args = [x, w, b.reshape(1, N)]
    if residual is not None:
        in_specs.append(pl.BlockSpec((tm, N), lambda i: (i, 0)))
        args.append(residual)
    return pl.pallas_call(
        _make_linear_kernel(activation, residual is not None),
        out_shape=jax.ShapeDtypeStruct((M, N), x.dtype),
        grid=(M // tm,),
        in_specs=in_specs,
        out_specs=pl.BlockSpec((tm, N), lambda i: (i, 0)),
        compiler_params=pltpu.CompilerParams(dimension_semantics=("parallel",)),
    )(*args)


# ---------------------------------------------------------------------------
# LayerNorm kernel (row-wise, eps = 1e-5, matches torch.nn.LayerNorm)
# ---------------------------------------------------------------------------
def _ln_kernel(x_ref, g_ref, b_ref, o_ref):
    x = x_ref[...].astype(jnp.float32)
    mu = jnp.mean(x, axis=-1, keepdims=True)
    xc = x - mu
    var = jnp.mean(xc * xc, axis=-1, keepdims=True)
    y = xc * jax.lax.rsqrt(var + 1e-5)
    y = y * g_ref[...].astype(jnp.float32) + b_ref[...].astype(jnp.float32)
    o_ref[...] = y.astype(o_ref.dtype)


def pallas_layernorm(x, gamma, beta):
    M, D = x.shape
    tm = _row_block(M)
    return pl.pallas_call(
        _ln_kernel,
        out_shape=jax.ShapeDtypeStruct((M, D), x.dtype),
        grid=(M // tm,),
        in_specs=[
            pl.BlockSpec((tm, D), lambda i: (i, 0)),
            pl.BlockSpec((1, D), lambda i: (0, 0)),
            pl.BlockSpec((1, D), lambda i: (0, 0)),
        ],
        out_specs=pl.BlockSpec((tm, D), lambda i: (i, 0)),
        compiler_params=pltpu.CompilerParams(dimension_semantics=("parallel",)),
    )(x, gamma.reshape(1, D), beta.reshape(1, D))


# ---------------------------------------------------------------------------
# attention kernel: one (batch*head) slice per grid step
# ---------------------------------------------------------------------------
def _make_attn_kernel(scale: float):
    def kernel(q_ref, k_ref, v_ref, o_ref):
        q = q_ref[0].astype(jnp.float32)  # (S, dh)
        k = k_ref[0].astype(jnp.float32)
        v = v_ref[0].astype(jnp.float32)
        s = jax.lax.dot_general(
            q, k, (((1,), (1,)), ((), ())), preferred_element_type=jnp.float32
        ) * scale                                             # (S, S) = q @ k^T
        s = s - jnp.max(s, axis=-1, keepdims=True)
        p = jnp.exp(s)
        p = p / jnp.sum(p, axis=-1, keepdims=True)
        o = jnp.dot(p, v, preferred_element_type=jnp.float32)  # (S, dh)
        o_ref[0] = o.astype(o_ref.dtype)

    return kernel


def pallas_attention(q, k, v):
    """q, k, v: (B*heads, S, dh) -> (B*heads, S, dh)."""
    BH, S, dh = q.shape
    scale = 1.0 / (dh ** 0.5)
    spec = pl.BlockSpec((1, S, dh), lambda i: (i, 0, 0))
    return pl.pallas_call(
        _make_attn_kernel(scale),
        out_shape=jax.ShapeDtypeStruct((BH, S, dh), q.dtype),
        grid=(BH,),
        in_specs=[spec, spec, spec],
        out_specs=spec,
        compiler_params=pltpu.CompilerParams(dimension_semantics=("parallel",)),
    )(q, k, v)


# ---------------------------------------------------------------------------
# parameters (deterministic, mirrors the torch module's build())
# ---------------------------------------------------------------------------
def init_params(key, *, in_channels, image_size, patch, width, layers, heads):
    del heads  # only used at forward time
    num_patches = (image_size // patch) ** 2
    seq = num_patches + 1
    scale = width ** -0.5
    keys = iter(jax.random.split(key, 3 + 4 * layers))
    cpp = in_channels * patch * patch
    p = {
        # conv1 weight stored pre-flattened/transposed: (C*P*P, D)
        "conv_w": jax.random.normal(next(keys), (cpp, width), jnp.float32) * (cpp ** -0.5),
        "conv_b": jnp.zeros((width,), jnp.float32),  # stem_conv_bias=False
        "class_embedding": scale * jax.random.normal(next(keys), (width,), jnp.float32),
        "positional_embedding": scale * jax.random.normal(next(keys), (seq, width), jnp.float32),
        "ln_pre_g": jnp.ones((width,), jnp.float32),
        "ln_pre_b": jnp.zeros((width,), jnp.float32),
        "ln_post_g": jnp.ones((width,), jnp.float32),
        "ln_post_b": jnp.zeros((width,), jnp.float32),
    }
    blocks = []
    for _ in range(layers):
        blocks.append({
            "ln1_g": jnp.ones((width,), jnp.float32),
            "ln1_b": jnp.zeros((width,), jnp.float32),
            "in_w": jax.random.normal(next(keys), (width, 3 * width), jnp.float32) * (width ** -0.5),
            "in_b": jnp.zeros((3 * width,), jnp.float32),
            "out_w": jax.random.normal(next(keys), (width, width), jnp.float32) * (width ** -0.5),
            "out_b": jnp.zeros((width,), jnp.float32),
            "ln2_g": jnp.ones((width,), jnp.float32),
            "ln2_b": jnp.zeros((width,), jnp.float32),
            "fc_w": jax.random.normal(next(keys), (width, 4 * width), jnp.float32) * (width ** -0.5),
            "fc_b": jnp.zeros((4 * width,), jnp.float32),
            "proj_w": jax.random.normal(next(keys), (4 * width, width), jnp.float32) * ((4 * width) ** -0.5),
            "proj_b": jnp.zeros((width,), jnp.float32),
        })
    p["layers"] = blocks
    return p


# ---------------------------------------------------------------------------
# Pallas forward pass
# ---------------------------------------------------------------------------
def visual_transformer_forward(params, x, *, patch, heads):
    # TODO(synk): pretrained=True path (F.interpolate to 224x224 + CLIP weight
    # download/load) is not implemented; this is the pretrained=False path.
    B, C, H, W = x.shape
    D = params["conv_w"].shape[1]
    gh, gw = H // patch, W // patch
    N = gh * gw
    S = N + 1
    dh = D // heads

    # patch-embed conv (stride == kernel, no bias) == patchify + matmul
    patches = x.reshape(B, C, gh, patch, gw, patch)
    patches = patches.transpose(0, 2, 4, 1, 3, 5).reshape(B * N, C * patch * patch)
    emb = pallas_linear(patches, params["conv_w"], params["conv_b"]).reshape(B, N, D)

    # prepend [CLS] token, add positional embedding (layout plumbing in JAX)
    cls = jnp.broadcast_to(params["class_embedding"].astype(emb.dtype)[None, None, :], (B, 1, D))
    tokens = jnp.concatenate([cls, emb], axis=1) + params["positional_embedding"][None].astype(emb.dtype)

    h = pallas_layernorm(tokens.reshape(B * S, D), params["ln_pre_g"], params["ln_pre_b"])  # (B*S, D)

    # NOTE: torch permutes (B,S,D)<->(S,B,D) only for nn.MultiheadAttention's
    # sequence-first convention; the batch-first math below is identical.
    for blk in params["layers"]:
        # pre-LN multi-head self-attention + residual
        xn = pallas_layernorm(h, blk["ln1_g"], blk["ln1_b"])
        qkv = pallas_linear(xn, blk["in_w"], blk["in_b"])                      # (B*S, 3D)
        qkv = qkv.reshape(B, S, 3, heads, dh).transpose(2, 0, 3, 1, 4)         # (3, B, h, S, dh)
        q, k, v = (qkv[i].reshape(B * heads, S, dh) for i in range(3))
        attn = pallas_attention(q, k, v)                                       # (B*h, S, dh)
        attn = attn.reshape(B, heads, S, dh).transpose(0, 2, 1, 3).reshape(B * S, D)
        h = pallas_linear(attn, blk["out_w"], blk["out_b"], residual=h)

        # pre-LN MLP (QuickGELU) + residual
        xn = pallas_layernorm(h, blk["ln2_g"], blk["ln2_b"])
        hid = pallas_linear(xn, blk["fc_w"], blk["fc_b"], activation="quick_gelu")
        h = pallas_linear(hid, blk["proj_w"], blk["proj_b"], residual=h)

    out = pallas_layernorm(h, params["ln_post_g"], params["ln_post_b"])        # ln_post on (B*S, D)
    return out.reshape(B, S, D)


# ---------------------------------------------------------------------------
# pure-JAX reference (mirrors the PyTorch forward)
# ---------------------------------------------------------------------------
def _ln_ref(x, g, b, eps=1e-5):
    mu = jnp.mean(x, axis=-1, keepdims=True)
    var = jnp.mean((x - mu) ** 2, axis=-1, keepdims=True)
    return (x - mu) * jax.lax.rsqrt(var + eps) * g + b


def reference_forward(params, x, *, patch, heads):
    B, C, H, W = x.shape
    D = params["conv_w"].shape[1]
    gh, gw = H // patch, W // patch
    N = gh * gw
    S = N + 1
    dh = D // heads
    scale = 1.0 / (dh ** 0.5)

    patches = x.reshape(B, C, gh, patch, gw, patch)
    patches = patches.transpose(0, 2, 4, 1, 3, 5).reshape(B * N, C * patch * patch)
    emb = (patches @ params["conv_w"] + params["conv_b"]).reshape(B, N, D)
    cls = jnp.broadcast_to(params["class_embedding"][None, None, :], (B, 1, D))
    tokens = jnp.concatenate([cls, emb], axis=1) + params["positional_embedding"][None]
    h = _ln_ref(tokens.reshape(B * S, D), params["ln_pre_g"], params["ln_pre_b"])

    for blk in params["layers"]:
        xn = _ln_ref(h, blk["ln1_g"], blk["ln1_b"])
        qkv = xn @ blk["in_w"] + blk["in_b"]
        qkv = qkv.reshape(B, S, 3, heads, dh).transpose(2, 0, 3, 1, 4)
        q, k, v = qkv[0], qkv[1], qkv[2]                                        # (B, h, S, dh)
        s = jnp.einsum("bhqd,bhkd->bhqk", q, k) * scale
        p = jax.nn.softmax(s, axis=-1)
        attn = jnp.einsum("bhqk,bhkd->bhqd", p, v)
        attn = attn.transpose(0, 2, 1, 3).reshape(B * S, D)
        h = h + (attn @ blk["out_w"] + blk["out_b"])
        xn = _ln_ref(h, blk["ln2_g"], blk["ln2_b"])
        hid = _quick_gelu(xn @ blk["fc_w"] + blk["fc_b"])
        h = h + (hid @ blk["proj_w"] + blk["proj_b"])

    out = _ln_ref(h, params["ln_post_g"], params["ln_post_b"])
    return out.reshape(B, S, D)


# ---------------------------------------------------------------------------
if __name__ == "__main__":
    # Module hyper-parameters (small, consistent with the PyTorch module)
    GRID_PATCH_SIZE = 8     # grid_patch_size
    WIDTH = 32              # transformer_num_filters
    LAYERS = 2              # transformer_num_layers
    HEADS = 4               # transformer_num_heads
    B, C, HW = 2, 4, 16     # input: (batch, channels, H, W)

    key = jax.random.PRNGKey(0)
    kx, kp = jax.random.split(key)
    x = jax.random.normal(kx, (B, C, HW, HW), jnp.float32)
    params = init_params(kp, in_channels=C, image_size=HW, patch=GRID_PATCH_SIZE,
                         width=WIDTH, layers=LAYERS, heads=HEADS)

    out = visual_transformer_forward(params, x, patch=GRID_PATCH_SIZE, heads=HEADS)
    out = jax.block_until_ready(out)

    ref = reference_forward(params, x, patch=GRID_PATCH_SIZE, heads=HEADS)
    S = (HW // GRID_PATCH_SIZE) ** 2 + 1
    assert out.shape == (B, S, WIDTH)
    assert out.dtype == x.dtype
    assert bool(jnp.all(jnp.isfinite(out)))
    assert bool(jnp.allclose(out, ref, atol=2e-2, rtol=2e-2))

    print("KERNEL_OK")
</pallas_src>

<mosaic_0001>
module attributes {stable_mosaic.version = 11 : i64} {
  func.func @kernel(%arg0: i32, %arg1: memref<8x256xf32, #tpu.memory_space<vmem>>, %arg2: memref<256x32xf32, #tpu.memory_space<vmem>>, %arg3: memref<1x32xf32, #tpu.memory_space<vmem>>, %arg4: memref<8x32xf32, #tpu.memory_space<vmem>>) attributes {dimension_semantics = [#tpu.dimension_semantics<parallel>], iteration_bounds = array<i64: 1>, scalar_prefetch = 0 : i64, scratch_operands = 0 : i64, tpu.core_type = #tpu.core_type<tc>, window_params = [{transform_indices = @transform_0, window_bounds = array<i64: 8, 256>}, {pipeline_mode = #tpu.pipeline_mode<synchronous>, transform_indices = @transform_1, window_bounds = array<i64: 256, 32>}, {pipeline_mode = #tpu.pipeline_mode<synchronous>, transform_indices = @transform_2, window_bounds = array<i64: 1, 32>}, {transform_indices = @transform_3, window_bounds = array<i64: 8, 32>}]} {
    %c0 = arith.constant 0 : index
    %c0_0 = arith.constant 0 : index
    %0 = vector.load %arg1[%c0, %c0_0] : memref<8x256xf32, #tpu.memory_space<vmem>>, vector<8x256xf32>
    %c0_1 = arith.constant 0 : index
    %c0_2 = arith.constant 0 : index
    %1 = vector.load %arg2[%c0_1, %c0_2] : memref<256x32xf32, #tpu.memory_space<vmem>>, vector<256x32xf32>
    %cst = arith.constant dense<0.000000e+00> : vector<8x32xf32>
    %2 = tpu.matmul %0, %1, %cst {dimension_numbers = #tpu.dot_dimension_numbers<[1], [0], [0], [1], [0, 0, 1, 1], [], []>} : vector<8x256xf32>, vector<256x32xf32>, vector<8x32xf32> -> vector<8x32xf32>
    %c0_3 = arith.constant 0 : index
    %c0_4 = arith.constant 0 : index
    %3 = vector.load %arg3[%c0_3, %c0_4] : memref<1x32xf32, #tpu.memory_space<vmem>>, vector<1x32xf32>
    %4 = vector.broadcast %3 : vector<1x32xf32> to vector<8x32xf32>
    %5 = arith.addf %2, %4 : vector<8x32xf32>
    %c0_5 = arith.constant 0 : index
    %c0_6 = arith.constant 0 : index
    %6 = vector.load %arg4[%c0_5, %c0_6] : memref<8x32xf32, #tpu.memory_space<vmem>>, vector<8x32xf32>
    tpu.vector_store %arg4[%c0_5, %c0_6], %5 {strides = array<i32>} : memref<8x32xf32, #tpu.memory_space<vmem>>, vector<8x32xf32>,
    return
  }
  func.func @transform_0(%arg0: i32) -> (i32, i32) {
    %c0_i32 = arith.constant 0 : i32
    %c0_i32_0 = arith.constant 0 : i32
    return %arg0, %c0_i32 : i32, i32
  }
  func.func @transform_1(%arg0: i32) -> (i32, i32) {
    %c0_i32 = arith.constant 0 : i32
    %c0_i32_0 = arith.constant 0 : i32
    %c0_i32_1 = arith.constant 0 : i32
    return %c0_i32, %c0_i32_0 : i32, i32
  }
  func.func @transform_2(%arg0: i32) -> (i32, i32) {
    %c0_i32 = arith.constant 0 : i32
    %c0_i32_0 = arith.constant 0 : i32
    %c0_i32_1 = arith.constant 0 : i32
    return %c0_i32, %c0_i32_0 : i32, i32
  }
  func.func @transform_3(%arg0: i32) -> (i32, i32) {
    %c0_i32 = arith.constant 0 : i32
    %c0_i32_0 = arith.constant 0 : i32
    return %arg0, %c0_i32 : i32, i32
  }
}

</mosaic_0001>

<bundles_post_ra>
// kernel: tpu_custom_call.1
= control target key start
LH: loop header
LB: loop body
LE: loop exit
PB: predicated region body
PF: predicated region fallthrough
CT: control target
= control target key end

     0   :  { %s330_s0 = inlined_call_operand.vmem [shape: f32[8,256], index: 0, kind: input, shape index: {}]   ;;  %s331_s1 = inlined_call_operand.vmem [shape: f32[256,32], index: 1, kind: input, shape index: {}]   ;;  %s332_s2 = inlined_call_operand.vmem [shape: f32[1,32], index: 2, kind: input, shape index: {}]   ;;  %s333_s3 = inlined_call_operand.hbm [shape: f32[8,32], index: 3, kind: output, shape index: {}]  }
   0x1   :  { %v48_v0 = vld [vmem:[%s331_s1 + $0xf8] sm:$0xff]  ;;  %v47_v2 = vld [vmem:[%s331_s1 + $0xf0] sm:$0xff]  ;;  %v46_v4 = vld [vmem:[%s331_s1 + $0xe8] sm:$0xff] }
   0x2   :  { %v32_v1 = vld [vmem:[%s331_s1 + $0x78] sm:$0xff]  ;;  %143 = vmatprep.subr.mxu0 %v48_v0  ;;  %v31_v3 = vld [vmem:[%s331_s1 + $0x70] sm:$0xff]  ;;  %v30_v5 = vld [vmem:[%s331_s1 + $0x68] sm:$0xff] }
   0x3   :  { %144 = vmatpush3.msra.mxu0 %v32_v1  ;;  %v45_v6 = vld [vmem:[%s331_s1 + $0xe0] sm:$0xff]  ;;  %v44_v8 = vld [vmem:[%s331_s1 + $0xd8] sm:$0xff]  ;;  %v43_v10 = vld [vmem:[%s331_s1 + $0xd0] sm:$0xff] }
   0x4   :  { %145 = vmatprep.subr.mxu0 %v47_v2  ;;  %v29_v7 = vld [vmem:[%s331_s1 + $0x60] sm:$0xff]  ;;  %v28_v9 = vld [vmem:[%s331_s1 + $0x58] sm:$0xff]  ;;  %v27_v11 = vld [vmem:[%s331_s1 + $0x50] sm:$0xff] }
   0x5   :  { %146 = vmatpush3.msra.mxu0 %v31_v3  ;;  %v42_v12 = vld [vmem:[%s331_s1 + $0xc8] sm:$0xff] }
   0x6   :  { %147 = vmatprep.subr.mxu0 %v46_v4  ;;  %v16_v13 = vld [vmem:[%s330_s0 + $0x8] sm:$0xff] }
   0x7   :  { %148 = vmatpush3.msra.mxu0 %v30_v5  ;;  %v26_v14 = vld [vmem:[%s331_s1 + $0x48] sm:$0xff]  ;;  %120 = vmatprep.mubr.f32.mxu0 %v16_v13 }
   0x8   :  { %149 = vmatprep.subr.mxu0 %v45_v6 }
   0x9   :  { %150 = vmatpush3.msra.mxu0 %v29_v7 }
   0xa   :  { %151 = vmatprep.subr.mxu0 %v44_v8 }
   0xb   :  { %152 = vmatpush3.msra.mxu0 %v28_v9 }
   0xc   :  { %153 = vmatprep.subr.mxu0 %v43_v10 }
   0xd   :  { %8 = vsyncpa [#allocation3], 0  ;;  %154 = vmatpush3.msra.mxu0 %v27_v11  ;;  %v41_v15 = vld [vmem:[%s331_s1 + $0xc0] sm:$0xff]  ;;  %v40_v17 = vld [vmem:[%s331_s1 + $0xb8] sm:$0xff]  ;;  %s201_s28 = smov [#allocation2]   ;;  %vm126_vm0 = vcmask 261120  }
   0xe   :  { %155 = vmatprep.subr.mxu0 %v42_v12  ;;  %v25_v16 = vld [vmem:[%s331_s1 + $0x40] sm:$0xff]  ;;  %v24_v18 = vld [vmem:[%s331_s1 + $0x38] sm:$0xff]  ;;  %v39_v19 = vld [vmem:[%s331_s1 + $0xb0] sm:$0xff]  ;;  %s134_s29 = sshll.u32 %s201_s28, 4  ;;  %s135_s29 = int_to_ptr.vmem [resolvable:$true] %s134_s29 }
   0xf   :  { %156 = vmatpush3.msra.mxu0 %v26_v14  ;;  %v23_v20 = vld [vmem:[%s331_s1 + $0x30] sm:$0xff]  ;;  %v38_v21 = vld [vmem:[%s331_s1 + $0xa8] sm:$0xff]  ;;  %v37_v23 = vld [vmem:[%s331_s1 + $0xa0] sm:$0xff]  ;;  %p184_p1 = scmp.lt.s32.totalorder %s135_s29, %s135_s29 }
  0x10   :  { %157 = vmatprep.subr.mxu0 %v41_v15  ;;  %v22_v22 = vld [vmem:[%s331_s1 + $0x28] sm:$0xff]  ;;  %v21_v24 = vld [vmem:[%s331_s1 + $0x20] sm:$0xff]  ;;  %v36_v25 = vld [vmem:[%s331_s1 + $0x98] sm:$0xff] }
  0x11   :  { %158 = vmatpush3.msra.mxu0 %v25_v16  ;;  %v20_v26 = vld [vmem:[%s331_s1 + $0x18] sm:$0xff]  ;;  %v35_v27 = vld [vmem:[%s331_s1 + $0x90] sm:$0xff]  ;;  %v34_v29 = vld [vmem:[%s331_s1 + $0x88] sm:$0xff] }
  0x12   :  { %159 = vmatprep.subr.mxu0 %v40_v17  ;;  %v19_v28 = vld [vmem:[%s331_s1 + $0x10] sm:$0xff]  ;;  %v18_v30 = vld [vmem:[%s331_s1 + $0x8] sm:$0xff]  ;;  %v33_v31 = vld [vmem:[%s331_s1 + $0x80] sm:$0xff] }
  0x13   :  { %160 = vmatpush3.msra.mxu0 %v24_v18  ;;  %v17_v32 = vld [vmem:[%s331_s1] sm:$0xff]  ;;  %s179_s1 = scalar_lea.vmem %s135_s29, 128 }
  0x14   :  { %161 = vmatprep.subr.mxu0 %v39_v19  ;;  %v15_v33 = vld [vmem:[%s330_s0] sm:$0xff]  ;;  %p180_p0 = scmp.ne.s32.totalorder %s135_s29, %s179_s1  ;;  %p185_p2 = scmp.lt.s32.totalorder %s179_s1, %s179_s1 }
  0x15   :  { %162 = vmatpush3.msra.mxu0 %v23_v20  ;;  %v142_v35 = vld [vmem:[%s332_s2] ss:$0 sm:$0xff] }
  0x16   :  { %163 = vmatprep.subr.mxu0 %v38_v21  ;;  %p186_p3 = por %p185_p2, %p184_p1 }
  0x17   :  { %164 = vmatpush3.msra.mxu0 %v22_v22 }
  0x18   :  { %165 = vmatprep.subr.mxu0 %v37_v23  ;;  %p187_p4 = pnand %p186_p3, %p180_p0 }
  0x19   :  { %166 = vmatpush3.msra.mxu0 %v21_v24 }
  0x1a   :  { %167 = vmatprep.subr.mxu0 %v36_v25 }
  0x1b   :  { %168 = vmatpush3.msra.mxu0 %v20_v26 }
  0x1c   :  { %169 = vmatprep.subr.mxu0 %v35_v27 }
  0x1d   :  { %170 = vmatpush3.msra.mxu0 %v19_v28 }
  0x1e   :  { %171 = vmatprep.subr.mxu0 %v34_v29 }
  0x1f   :  { %172 = vmatpush3.msra.mxu0 %v18_v30 }
  0x20   :  { %173 = vmatprep.subr.mxu0 %v33_v31 }
  0x21   :  { %174 = vmatpush3.msra.mxu0 %v17_v32 }
  0x22   :  { %121 = vmatmul.mubr.f32.vlgmr.msra.gmra.mxu0 %v15_v33 }
  0xe2   :  { %v175_v34 = vpop.f32.mrf.mxu0 }
  0xe4   :  { %v176_v36 = vpop.f32.mrf.mxu0 }
  0xe5   :  { %v177_v37 = vadd.f32 %v176_v36, %v175_v34 }
  0xe7   :  { %v123_v38 = vadd.f32 %v177_v37, %v142_v35 }
  0xe9   :  { %127 = vst.msk [vmem:[#allocation2] sm:$0xff] %vm126_vm0, %v123_v38 }
  0xea   :  { %190 = shalt.err (!%p187_p4)
}
  0xeb   :  { %137 = dma.vmem_to_hbm [thread:$0]  %s135_s29, 128, %s333_s3, [#allocation3]  }
  0xec   :  { %199 = dma.done.wait [#allocation3], 128  }
  0xed   :  { %200 = vsyncadd [#allocation3], 4294967168 }
  0xee   :  { %141 = vsyncpa [#allocation3], 1 }

</bundles_post_ra>
